<compile_context>
chip_gen: v7x
topology: tpu7x:2x2x1
jax: 0.10.0
libtpu: 0.0.40
codegen_flags: <defaults>
</compile_context>

<pallas_src>
import functools
from math import sqrt

import jax
import jax.numpy as jnp
from jax.experimental import pallas as pl
from jax.experimental.pallas import tpu as pltpu


# ----------------------------------------------------------------------------
# AdaIN kernel: one (row-tile) block per grid step.
#   x_ref: (tr, HW)   g_ref/b_ref: (tr, 1)   o_ref: (tr, HW)
# Each row is one (batch, channel) pair; statistics are per-row over HW.
# ----------------------------------------------------------------------------
def adain_kernel(x_ref, g_ref, b_ref, o_ref, *, eps, inv_hw):
    # Statistics and the FMA are done in f32 (v5e has no bf16 VALU; exact
    # accumulation regardless of input dtype).
    x = x_ref[...].astype(jnp.float32)                  # (tr, HW)

    # One-pass per-row statistics over the (lane-dense) spatial axis.
    s1 = jnp.sum(x, axis=-1, keepdims=True)             # (tr, 1)
    s2 = jnp.sum(x * x, axis=-1, keepdims=True)         # (tr, 1)
    mean = s1 * inv_hw
    # Biased variance (InstanceNorm2d); clamp guards against cancellation.
    var = jnp.maximum(s2 * inv_hw - mean * mean, 0.0)

    gamma = g_ref[...].astype(jnp.float32)              # (tr, 1)
    beta = b_ref[...].astype(jnp.float32)               # (tr, 1)

    scale = gamma * jax.lax.rsqrt(var + eps)            # rsqrt -> EUP slot
    shift = beta - mean * scale

    # Single FMA per element, broadcast over the lane dim.
    o_ref[...] = (x * scale + shift).astype(o_ref.dtype)


def _choose_rows(n_rows, hw, itemsize, target_block_bytes=2 * 1024 * 1024):
    """Row-tile size so double-buffered in+out x blocks plus f32 temporaries
    stay comfortably under the default scoped VMEM limit (16 MiB on v5e,
    32 MiB on v6e/v7x).  Prefers an exact divisor of n_rows (no masked tail
    block); second-to-last block dim must be a multiple of 8 or the full dim."""
    max_rows = max(1, target_block_bytes // (hw * itemsize))
    if max_rows >= n_rows:
        return n_rows                      # full row dim (no divisibility constraint)
    tr = max(8, (max_rows // 8) * 8)
    for cand in range(tr, 7, -8):          # prefer a divisor of n_rows
        if n_rows % cand == 0:
            return cand
    return tr


# ----------------------------------------------------------------------------
# Wrapper
# ----------------------------------------------------------------------------
def adaptive_instance_norm(x, style, weight_orig, bias, eps=1e-5):
    """x: (B, C, H, W); style: (B, S);
    weight_orig: (2C, S) f32 (PyTorch Linear layout); bias: (2C,) f32."""
    B, C, H, W = x.shape
    S = style.shape[1]
    HW = H * W
    N = B * C

    # ---- equalized-lr style linear ----
    # (B,S) x (S,2C) with B,S in the single digits: not worth a dedicated
    # pallas_call (launch + HBM round trip of style_out).  Fold the equal_lr
    # scale into the weight once and let XLA do the tiny matmul.
    w = (weight_orig.astype(jnp.float32) * sqrt(2.0 / S)).T               # (S, 2C)
    style_out = style.astype(jnp.float32) @ w + bias.astype(jnp.float32)  # (B, 2C)
    gamma = style_out[:, :C].reshape(N, 1)                                # row-major matches x
    beta = style_out[:, C:].reshape(N, 1)

    # Lane-dense spatial layout: last dim H*W goes to the lane dimension;
    # (B, C) collapse to one row axis so tiles can span batches.
    x_flat = x.reshape(N, HW)

    tr = _choose_rows(N, HW, x.dtype.itemsize)
    grid = (pl.cdiv(N, tr),)

    out = pl.pallas_call(
        functools.partial(adain_kernel, eps=eps, inv_hw=1.0 / HW),
        out_shape=jax.ShapeDtypeStruct((N, HW), x.dtype),
        grid=grid,
        in_specs=[
            pl.BlockSpec((tr, HW), lambda i: (i, 0)),
            pl.BlockSpec((tr, 1), lambda i: (i, 0)),
            pl.BlockSpec((tr, 1), lambda i: (i, 0)),
        ],
        out_specs=pl.BlockSpec((tr, HW), lambda i: (i, 0)),
        compiler_params=pltpu.CompilerParams(
            dimension_semantics=("parallel",)),
    )(x_flat, gamma, beta)

    return out.reshape(B, C, H, W)


# ----------------------------------------------------------------------------
# Pure-JAX reference (for correctness check only)
# ----------------------------------------------------------------------------
def adaptive_instance_norm_ref(x, style, weight_orig, bias, eps=1e-5):
    S = style.shape[1]
    w = weight_orig * sqrt(2.0 / S)
    style_out = style @ w.T + bias
    C = x.shape[1]
    gamma = style_out[:, :C].reshape(-1, C, 1, 1)
    beta = style_out[:, C:].reshape(-1, C, 1, 1)
    mean = jnp.mean(x, axis=(2, 3), keepdims=True)
    var = jnp.var(x, axis=(2, 3), keepdims=True)
    norm = (x - mean) * jax.lax.rsqrt(var + eps)
    return gamma * norm + beta


if __name__ == "__main__":
    B, C, H, W = 2, 4, 16, 16
    style_dim = 8

    key = jax.random.PRNGKey(0)
    kx, ks, kw = jax.random.split(key, 3)

    x = jax.random.normal(kx, (B, C, H, W), dtype=jnp.float32)
    style = jax.random.normal(ks, (B, style_dim), dtype=jnp.float32)

    # EqualLinear init: weight ~ N(0,1); AdaIN bias: first C ones, last C zeros.
    weight_orig = jax.random.normal(kw, (2 * C, style_dim), dtype=jnp.float32)
    bias = jnp.concatenate(
        [jnp.ones((C,), jnp.float32), jnp.zeros((C,), jnp.float32)]
    )

    out = adaptive_instance_norm(x, style, weight_orig, bias)
    out = jax.block_until_ready(out)

    ref = adaptive_instance_norm_ref(x, style, weight_orig, bias)
    assert out.shape == (B, C, H, W)
    assert jnp.allclose(out, ref, atol=1e-4, rtol=1e-4), "mismatch vs reference"

    print("KERNEL_OK")
</pallas_src>

<mosaic_0001>
module attributes {stable_mosaic.version = 11 : i64} {
  func.func @adain_kernel(%arg0: i32, %arg1: memref<8x256xf32, #tpu.memory_space<vmem>>, %arg2: memref<8x1xf32, #tpu.memory_space<vmem>>, %arg3: memref<8x1xf32, #tpu.memory_space<vmem>>, %arg4: memref<8x256xf32, #tpu.memory_space<vmem>>) attributes {dimension_semantics = [#tpu.dimension_semantics<parallel>], iteration_bounds = array<i64: 1>, scalar_prefetch = 0 : i64, scratch_operands = 0 : i64, tpu.core_type = #tpu.core_type<tc>, window_params = [{transform_indices = @transform_0, window_bounds = array<i64: 8, 256>}, {transform_indices = @transform_1, window_bounds = array<i64: 8, 1>}, {transform_indices = @transform_2, window_bounds = array<i64: 8, 1>}, {transform_indices = @transform_3, window_bounds = array<i64: 8, 256>}]} {
    %c0 = arith.constant 0 : index
    %c0_0 = arith.constant 0 : index
    %0 = vector.load %arg1[%c0, %c0_0] : memref<8x256xf32, #tpu.memory_space<vmem>>, vector<8x256xf32>
    %cst = arith.constant dense<0.000000e+00> : vector<8xf32>
    %1 = vector.multi_reduction <add>, %0, %cst [1] : vector<8x256xf32> to vector<8xf32>
    %2 = vector.shape_cast %1 : vector<8xf32> to vector<8x1xf32>
    %3 = arith.mulf %0, %0 : vector<8x256xf32>
    %cst_1 = arith.constant dense<0.000000e+00> : vector<8xf32>
    %4 = vector.multi_reduction <add>, %3, %cst_1 [1] : vector<8x256xf32> to vector<8xf32>
    %5 = vector.shape_cast %4 : vector<8xf32> to vector<8x1xf32>
    %cst_2 = arith.constant 3.906250e-03 : f32
    %6 = vector.broadcast %cst_2 : f32 to vector<8x1xf32>
    %7 = arith.mulf %2, %6 : vector<8x1xf32>
    %cst_3 = arith.constant 3.906250e-03 : f32
    %8 = vector.broadcast %cst_3 : f32 to vector<8x1xf32>
    %9 = arith.mulf %5, %8 : vector<8x1xf32>
    %10 = arith.mulf %7, %7 : vector<8x1xf32>
    %11 = arith.subf %9, %10 : vector<8x1xf32>
    %cst_4 = arith.constant 0.000000e+00 : f32
    %12 = vector.broadcast %cst_4 : f32 to vector<8x1xf32>
    %13 = arith.maximumf %11, %12 : vector<8x1xf32>
    %c0_5 = arith.constant 0 : index
    %c0_6 = arith.constant 0 : index
    %14 = vector.load %arg2[%c0_5, %c0_6] : memref<8x1xf32, #tpu.memory_space<vmem>>, vector<8x1xf32>
    %c0_7 = arith.constant 0 : index
    %c0_8 = arith.constant 0 : index
    %15 = vector.load %arg3[%c0_7, %c0_8] : memref<8x1xf32, #tpu.memory_space<vmem>>, vector<8x1xf32>
    %cst_9 = arith.constant 9.99999974E-6 : f32
    %16 = vector.broadcast %cst_9 : f32 to vector<8x1xf32>
    %17 = arith.addf %13, %16 : vector<8x1xf32>
    %18 = math.rsqrt %17 : vector<8x1xf32>
    %19 = arith.mulf %14, %18 : vector<8x1xf32>
    %20 = arith.mulf %7, %19 : vector<8x1xf32>
    %21 = arith.subf %15, %20 : vector<8x1xf32>
    %22 = vector.broadcast %19 : vector<8x1xf32> to vector<8x256xf32>
    %23 = arith.mulf %0, %22 : vector<8x256xf32>
    %24 = vector.broadcast %21 : vector<8x1xf32> to vector<8x256xf32>
    %25 = arith.addf %23, %24 : vector<8x256xf32>
    %c0_10 = arith.constant 0 : index
    %c0_11 = arith.constant 0 : index
    %26 = vector.load %arg4[%c0_10, %c0_11] : memref<8x256xf32, #tpu.memory_space<vmem>>, vector<8x256xf32>
    tpu.vector_store %arg4[%c0_10, %c0_11], %25 {strides = array<i32>} : memref<8x256xf32, #tpu.memory_space<vmem>>, vector<8x256xf32>,
    return
  }
  func.func @transform_0(%arg0: i32) -> (i32, i32) {
    %c0_i32 = arith.constant 0 : i32
    %c0_i32_0 = arith.constant 0 : i32
    return %arg0, %c0_i32 : i32, i32
  }
  func.func @transform_1(%arg0: i32) -> (i32, i32) {
    %c0_i32 = arith.constant 0 : i32
    %c0_i32_0 = arith.constant 0 : i32
    return %arg0, %c0_i32 : i32, i32
  }
  func.func @transform_2(%arg0: i32) -> (i32, i32) {
    %c0_i32 = arith.constant 0 : i32
    %c0_i32_0 = arith.constant 0 : i32
    return %arg0, %c0_i32 : i32, i32
  }
  func.func @transform_3(%arg0: i32) -> (i32, i32) {
    %c0_i32 = arith.constant 0 : i32
    %c0_i32_0 = arith.constant 0 : i32
    return %arg0, %c0_i32 : i32, i32
  }
}

</mosaic_0001>

<bundles_post_ra>
// kernel: tpu_custom_call.1
= control target key start
LH: loop header
LB: loop body
LE: loop exit
PB: predicated region body
PF: predicated region fallthrough
CT: control target
= control target key end

     0   :  { %s143_s0 = inlined_call_operand.vmem [shape: f32[8,256], index: 0, kind: input, shape index: {}]   ;;  %s144_s1 = inlined_call_operand.vmem [shape: f32[8,1], index: 1, kind: input, shape index: {}]   ;;  %s145_s2 = inlined_call_operand.vmem [shape: f32[8,1], index: 2, kind: input, shape index: {}]   ;;  %s146_s3 = inlined_call_operand.hbm [shape: f32[8,256], index: 3, kind: output, shape index: {}]  }
   0x1   :  { %v15_v0 = vld [vmem:[%s143_s0] sm:$0xff]  ;;  %v16_v1 = vld [vmem:[%s143_s0 + $0x8] sm:$0xff] }
   0x2   :  { %8 = vsyncpa [#allocation3], 0  ;;  %v17_v2 = vadd.f32 %v16_v1, %v15_v0  ;;  %v20_v3 = vmul.f32 %v15_v0, %v15_v0  ;;  %v21_v4 = vmul.f32 %v16_v1, %v16_v1  ;;  %v97_v6 = vmov 0   ;;  %v30_v15 = vld [vmem:[%s144_s1] sm:$0xff]  ;;  %s98_s19 = smov [#allocation2]  }
   0x3   :  { %69 = vset.pattern.permute.xlu1 %v97_v6  ;;  %70 = vset.pattern.permute.xlu0 %v97_v6  ;;  %v31_v18 = vld [vmem:[%s145_s2] sm:$0xff]  ;;  %s59_s20 = sshll.u32 %s98_s19, 4  ;;  %s60_s20 = int_to_ptr.vmem [resolvable:$true] %s59_s20 }
   0x4   :  { %18 = vadd.xlane.f32.xlu0 %v17_v2  ;;  %v22_v5 = vadd.f32 %v21_v4, %v20_v3  ;;  %s73_s1 = scalar_lea.vmem %s60_s20, 256  ;;  %p78_p1 = scmp.lt.s32.totalorder %s60_s20, %s60_s20 }
   0x5   :  { %p74_p0 = scmp.ne.s32.totalorder %s60_s20, %s73_s1  ;;  %p79_p2 = scmp.lt.s32.totalorder %s73_s1, %s73_s1 }
   0x7   :  { %p80_p3 = por %p79_p2, %p78_p1 }
   0x8   :  { %23 = vadd.xlane.f32.xlu0 %v22_v5 }
   0x9   :  { %p81_p4 = pnand %p80_p3, %p74_p0 }
  0x91   :  { %v19_v7 = vpop.xlane.xlu0 %18 }
  0x92   :  { %v25_v8 = vmul.f32 0.00390625, %v19_v7 }
  0x94   :  { %v27_v10 = vmul.f32 %v25_v8, %v25_v8 }
  0x95   :  { %v24_v9 = vpop.xlane.xlu0 %23 }
  0x96   :  { %v26_v11 = vmul.f32 0.00390625, %v24_v9 }
  0x98   :  { %v28_v12 = vsub.f32 %v26_v11, %v27_v10 }
  0x9a   :  { %v29_v13 = vmax.f32 %v28_v12, 0.0 }
  0x9c   :  { %v32_v14 = vadd.f32 1e-05, %v29_v13 }
  0x9e   :  { %71 = vrsqrt.f32 %v32_v14 }
  0xa8   :  { %v72_v16 = vpop.eup %71 }
  0xa9   :  { %v34_v17 = vmul.f32 %v72_v16, %v30_v15 }
  0xab   :  { %39 = vperm.xlu1 %69, %v34_v17   ;;  %v35_v19 = vmul.f32 %v34_v17, %v25_v8 }
  0xad   :  { %v36_v20 = vsub.f32 %v31_v18, %v35_v19 }
  0xaf   :  { %46 = vperm.xlu1 %69, %v36_v20  }
 0x12a   :  { %v40_v21 = vpop.permute.xlu1 %39 }
 0x12b   :  { %v42_v22 = vmul.f32 %v40_v21, %v15_v0  ;;  %v43_v23 = vmul.f32 %v40_v21, %v16_v1 }
 0x12e   :  { %v47_v24 = vpop.permute.xlu1 %46 }
 0x12f   :  { %v49_v25 = vadd.f32 %v47_v24, %v42_v22  ;;  %v50_v26 = vadd.f32 %v47_v24, %v43_v23 }
 0x131   :  { %51 = vst [vmem:[#allocation2] sm:$0xff] %v49_v25  ;;  %52 = vst [vmem:[#allocation2 + $0x8] sm:$0xff] %v50_v26 }
 0x132   :  { %84 = shalt.err (!%p81_p4)
}
 0x133   :  { %s85_s22 = scalar_lea.hbm %s146_s3, 256 }
 0x134   :  { %p86_p5 = scmp.ne.s32.totalorder %s146_s3, %s85_s22  ;;  %p89_p6 = scmp.lt.u32.totalorder %s85_s22, %s146_s3 }
 0x136   :  { %p91_p7 = pnand %p89_p6, %p86_p5 }
 0x138   :  { %94 = shalt.err (!%p91_p7)
}
 0x139   :  { %62 = dma.vmem_to_hbm [thread:$0]  %s60_s20, 256, %s146_s3, [#allocation3]  }
 0x13a   :  { %95 = dma.done.wait [#allocation3], 256  }
 0x13b   :  { %96 = vsyncadd [#allocation3], 4294967040 }
 0x13c   :  { %66 = vsyncpa [#allocation3], 1 }

</bundles_post_ra>
